<compile_context>
chip_gen: v7x
topology: tpu7x:2x2x1
jax: 0.10.0
libtpu: 0.0.40
codegen_flags: <defaults>
</compile_context>

<pallas_src>
import collections
import functools
import math

import jax
import jax.numpy as jnp
from jax import lax
from jax.experimental import pallas as pl
from jax.experimental.pallas import tpu as pltpu

_LANES = 128
_ACC_ROWS = 8           # accumulator tile: one full (8,128) vreg, unmasked store
_CHUNK_ROWS = 256       # inner reduction chunk rows (keeps temps ~32 vregs/operand)
_VMEM_INPUT_BUDGET = 24 << 20   # budget for double-buffered input windows

_Region = collections.namedtuple(
    "_Region", ["rows", "block_rows", "count", "chunks", "needs_mask"])


def _round_up(x, m):
    return ((x + m - 1) // m) * m


def _default_block_rows():
    """Rows (x128 lanes) per grid step, by TPU generation."""
    try:
        kind = jax.devices()[0].device_kind.lower()
    except Exception:
        return 2048
    # v6e/v7x HBM (>=1.4 TB/s) needs ~4096 rows to amortize the ~0.35us
    # per-grid-step overhead; v5e (~0.8 TB/s) saturates around 2048.
    if "v6" in kind or "v7" in kind:
        return 4096
    return 2048


def _region_meta(rows, bm):
    """Static tiling plan for one reduction region (one input tensor)."""
    if rows <= bm:
        # Single full-extent block: block dim == array dim is always legal,
        # never exceeds the array, and needs no masking.
        block_rows, count, needs_mask = rows, 1, False
        chunks, off = [], 0
        while off < rows:
            size = min(_CHUNK_ROWS, rows - off)
            chunks.append((off, size))
            off += size
    else:
        # Multi-block region: bm is a multiple of 8 (and of _CHUNK_ROWS); the
        # last block may be ragged -> masked in-kernel.
        block_rows = bm
        count = pl.cdiv(rows, block_rows)
        needs_mask = (rows % block_rows) != 0
        chunks = [(o, _CHUNK_ROWS) for o in range(0, block_rows, _CHUNK_ROWS)]
    return _Region(rows=rows, block_rows=block_rows, count=count,
                   chunks=tuple(chunks), needs_mask=needs_mask)


# ----------------------------- Pallas kernel ------------------------------- #

def _row_mask(value, neutral, row0, off, rows_true):
    ridx = row0 + off + lax.broadcasted_iota(jnp.int32, value.shape, 0)
    return jnp.where(ridx < rows_true, value, neutral)


def _block_partial(contrib_fn, chunks):
    """Sum contrib_fn(offset, size) over static sub-chunks -> (1,128) f32."""
    acc = jnp.zeros((1, _LANES), jnp.float32)
    for off, size in chunks:
        acc = acc + jnp.sum(contrib_fn(off, size), axis=0, keepdims=True)
    return acc


def _dvc_sums_kernel(x_ref, t_ref, *rest, mse, liks):
    """Grid step i handles one block of exactly one region.

    Steps [0, nm)                      : squared-error blocks of x_hat/target
    Steps [nm, nm + sum(counts))       : log blocks of each likelihood tensor
    Accumulates into resident (8,128) f32 output tiles (written back once).
    """
    *lik_refs, sse_ref, log_ref = rest
    i = pl.program_id(0)
    nm = mse.count

    @pl.when(i == 0)
    def _():
        sse_ref[...] = jnp.zeros_like(sse_ref)
        log_ref[...] = jnp.zeros_like(log_ref)

    # ---- squared-error region ----
    @pl.when(i < nm)
    def _():
        row0 = i * mse.block_rows

        def contrib(off, size):
            xb = x_ref[pl.ds(off, size), :].astype(jnp.float32)
            tb = t_ref[pl.ds(off, size), :].astype(jnp.float32)
            d = xb - tb
            if mse.needs_mask:
                d = _row_mask(d, jnp.float32(0.0), row0, off, mse.rows)
            return d * d

        part = _block_partial(contrib, mse.chunks)
        sse_ref[pl.ds(0, 1), :] = sse_ref[pl.ds(0, 1), :] + part

    # ---- log-likelihood regions ----
    offset = nm
    for lik_ref, meta in zip(lik_refs, liks):
        lo, hi = offset, offset + meta.count

        @pl.when((i >= lo) & (i < hi))
        def _(lik_ref=lik_ref, lo=lo, meta=meta):
            row0 = (i - lo) * meta.block_rows

            def contrib(off, size):
                v = lik_ref[pl.ds(off, size), :].astype(jnp.float32)
                if meta.needs_mask:
                    v = _row_mask(v, jnp.float32(1.0), row0, off, meta.rows)
                return jnp.log(v)

            part = _block_partial(contrib, meta.chunks)
            log_ref[pl.ds(0, 1), :] = log_ref[pl.ds(0, 1), :] + part

        offset = hi


# ------------------------------- wrappers ---------------------------------- #

def _prep_2d(x, pad_value):
    """Flatten into a lane-dense (rows, 128) view.

    Pure reshape when the element count is a multiple of 128 (the common
    case); otherwise only the <128-element tail is padded with a neutral
    value (0 for MSE, 1 for log).
    """
    flat = x.reshape(-1)
    n = flat.shape[0]
    padded = _round_up(n, _LANES)
    if padded != n:
        # TODO(synk): a fully copy-free ragged-lane path would need 1-D blocks
        # or wrapper-side tail math; this pad costs one extra HBM copy.
        flat = jnp.pad(flat, (0, padded - n), constant_values=pad_value)
    return flat.reshape(padded // _LANES, _LANES)


def _fused_sums(x_hat, target, likelihoods, *, block_rows=None):
    """Returns (sum((x_hat-target)^2), sum_k sum(log(likelihood_k)))."""
    x2d = _prep_2d(x_hat, 0.0)
    t2d = _prep_2d(target, 0.0)
    lik2d = [_prep_2d(l, 1.0) for l in likelihoods]   # pad value 1: log(1) == 0

    # Generation-aware block rows, shrunk while the double-buffered input
    # windows exceed the VMEM budget.
    bm = block_rows if block_rows is not None else _default_block_rows()
    while True:
        mse = _region_meta(x2d.shape[0], bm)
        liks = tuple(_region_meta(l.shape[0], bm) for l in lik2d)
        footprint = 2 * mse.block_rows * _LANES * (
            x2d.dtype.itemsize + t2d.dtype.itemsize)
        footprint += sum(2 * m.block_rows * _LANES * l.dtype.itemsize
                         for m, l in zip(liks, lik2d))
        if footprint <= _VMEM_INPUT_BUDGET or bm <= _CHUNK_ROWS:
            break
        bm //= 2

    nm = mse.count
    total = nm + sum(m.count for m in liks)

    def xt_map(i):                               # clamp while in the log regions
        return (jnp.minimum(i, nm - 1), 0)

    in_specs = [pl.BlockSpec((mse.block_rows, _LANES), xt_map),
                pl.BlockSpec((mse.block_rows, _LANES), xt_map)]
    offset = nm
    for m in liks:
        lo, count = offset, m.count
        in_specs.append(pl.BlockSpec(
            (m.block_rows, _LANES),
            lambda i, lo=lo, count=count: (jnp.clip(i - lo, 0, count - 1), 0)))
        offset += count

    kernel = functools.partial(_dvc_sums_kernel, mse=mse, liks=liks)

    n_lik = sum(l.size for l in lik2d)
    cost = pl.CostEstimate(
        flops=3 * x2d.size + n_lik,
        transcendentals=n_lik,
        bytes_accessed=(x2d.size * x2d.dtype.itemsize
                        + t2d.size * t2d.dtype.itemsize
                        + sum(l.size * l.dtype.itemsize for l in lik2d)
                        + 2 * _ACC_ROWS * _LANES * 4))

    vmem_limit = int(min(max(footprint + (4 << 20), 16 << 20), 48 << 20))
    acc_spec = pl.BlockSpec((_ACC_ROWS, _LANES), lambda i: (0, 0))

    sse_tile, log_tile = pl.pallas_call(
        kernel,
        out_shape=(jax.ShapeDtypeStruct((_ACC_ROWS, _LANES), jnp.float32),
                   jax.ShapeDtypeStruct((_ACC_ROWS, _LANES), jnp.float32)),
        grid=(total,),
        in_specs=in_specs,
        out_specs=(acc_spec, acc_spec),
        compiler_params=pltpu.CompilerParams(
            # The grid axis carries the resident accumulators -> "arbitrary".
            # TODO(synk): on v7x (2 TensorCores) a byte-balanced 2-level grid
            # would recover cross-core parallelism; this single axis is the
            # optimal layout for single-TC v5e/v6e.
            dimension_semantics=("arbitrary",),
            vmem_limit_bytes=vmem_limit),
        cost_estimate=cost,
    )(x2d, t2d, *lik2d)

    return jnp.sum(sse_tile), jnp.sum(log_tile)


def dvc_loss(output, target, lmbda):
    """JAX/Pallas equivalent of DVCLoss.forward.

    output: {'x_hat': (N,C,H,W), 'likelihoods': {name: array}}
    target: (N,C,H,W);  lmbda: python float
    """
    N, _, H, W = target.shape
    num_pixels = N * H * W

    x_hat = output["x_hat"]
    assert x_hat.shape == target.shape
    liks = [l for l in output["likelihoods"].values() if l.size > 0]

    if x_hat.size > 0:
        sse, log_sum = _fused_sums(x_hat, target, liks)
    else:  # degenerate shapes: keep index maps safe, fall back to plain JAX
        sse = jnp.float32(0.0)
        log_sum = (sum(jnp.sum(jnp.log(l)) for l in liks)
                   if liks else jnp.float32(0.0))

    # bpp_loss = sum_k( sum(log(lik_k)) ) / (-log(2) * num_pixels)
    bpp_loss = log_sum / jnp.float32(-math.log(2) * num_pixels)

    # mse_loss = mean((x_hat - target)^2)
    mse_loss = sse / jnp.float32(max(x_hat.size, 1))

    # TODO(synk): PyTorch uses .item()-based host control flow for psnr;
    # replaced with a traced jnp.where of identical value semantics.
    psnr = jnp.where(
        mse_loss > 0,
        10.0 * jnp.log(1.0 / jnp.maximum(mse_loss, 1e-38)) / jnp.log(10.0),
        0.0)
    psnr = jnp.where(jnp.isinf(psnr), 0.0, psnr)

    loss = lmbda * (255.0 ** 2) * mse_loss + bpp_loss

    return {"bpp_loss": bpp_loss, "mse_loss": mse_loss,
            "psnr": psnr, "loss": loss}


# --------------------------------- main ------------------------------------ #

if __name__ == "__main__":
    key = jax.random.PRNGKey(0)
    k1, k2, k3, k4, k5 = jax.random.split(key, 5)

    N, C, H, W = 2, 3, 16, 16
    target = jax.random.uniform(k1, (N, C, H, W), dtype=jnp.float32)
    x_hat = jnp.clip(
        target + 0.05 * jax.random.normal(k2, (N, C, H, W), dtype=jnp.float32),
        0.0, 1.0)

    # likelihoods in (0, 1); "w" deliberately has a non-multiple-of-128 size
    lik_y = jax.nn.sigmoid(jax.random.normal(k3, (N, 8, 8, 8), dtype=jnp.float32))
    lik_z = jax.nn.sigmoid(jax.random.normal(k4, (N, 4, 4, 4), dtype=jnp.float32))
    lik_w = jax.nn.sigmoid(jax.random.normal(k5, (N, 5, 7, 3), dtype=jnp.float32))

    output = {"x_hat": x_hat, "likelihoods": {"y": lik_y, "z": lik_z, "w": lik_w}}
    lmbda = 0.01

    out = dvc_loss(output, target, lmbda)
    out = jax.tree_util.tree_map(jax.block_until_ready, out)

    # reference check in plain JAX
    num_pixels = N * H * W
    ref_bpp = sum(jnp.sum(jnp.log(l)) for l in (lik_y, lik_z, lik_w)) / (
        -math.log(2) * num_pixels)
    ref_mse = jnp.mean((x_hat - target) ** 2)
    ref_loss = lmbda * 255.0 ** 2 * ref_mse + ref_bpp

    assert jnp.allclose(out["bpp_loss"], ref_bpp, rtol=1e-5, atol=1e-5)
    assert jnp.allclose(out["mse_loss"], ref_mse, rtol=1e-5, atol=1e-6)
    assert jnp.allclose(out["loss"], ref_loss, rtol=1e-5, atol=1e-5)

    # stress check: multi-block region + ragged-row masking + lane-pad path
    xs = jax.random.uniform(k1, (1, 5, 100, 77), dtype=jnp.float32)
    ts = jax.random.uniform(k2, (1, 5, 100, 77), dtype=jnp.float32)
    ls = jax.nn.sigmoid(jax.random.normal(k3, (3, 11, 13, 7), dtype=jnp.float32))
    sse_s, log_s = _fused_sums(xs, ts, [ls], block_rows=256)
    sse_s, log_s = jax.block_until_ready(sse_s), jax.block_until_ready(log_s)
    assert jnp.allclose(sse_s, jnp.sum((xs - ts) ** 2), rtol=1e-4, atol=1e-4)
    assert jnp.allclose(log_s, jnp.sum(jnp.log(ls)), rtol=1e-4, atol=1e-4)

    print("KERNEL_OK")
</pallas_src>

<mosaic_0001>
module attributes {stable_mosaic.version = 11 : i64} {
  func.func @_dvc_sums_kernel(%arg0: i32, %arg1: memref<12x128xf32, #tpu.memory_space<vmem>>, %arg2: memref<12x128xf32, #tpu.memory_space<vmem>>, %arg3: memref<8x128xf32, #tpu.memory_space<vmem>>, %arg4: memref<1x128xf32, #tpu.memory_space<vmem>>, %arg5: memref<2x128xf32, #tpu.memory_space<vmem>>, %arg6: memref<8x128xf32, #tpu.memory_space<vmem>>, %arg7: memref<8x128xf32, #tpu.memory_space<vmem>>) attributes {dimension_semantics = [#tpu.dimension_semantics<arbitrary>], iteration_bounds = array<i64: 4>, scalar_prefetch = 0 : i64, scratch_operands = 0 : i64, tpu.core_type = #tpu.core_type<tc>, window_params = [{transform_indices = @transform_0, window_bounds = array<i64: 12, 128>}, {transform_indices = @transform_1, window_bounds = array<i64: 12, 128>}, {transform_indices = @transform_2, window_bounds = array<i64: 8, 128>}, {transform_indices = @transform_3, window_bounds = array<i64: 1, 128>}, {transform_indices = @transform_4, window_bounds = array<i64: 2, 128>}, {pipeline_mode = #tpu.pipeline_mode<synchronous>, transform_indices = @transform_5, window_bounds = array<i64: 8, 128>}, {pipeline_mode = #tpu.pipeline_mode<synchronous>, transform_indices = @transform_6, window_bounds = array<i64: 8, 128>}]} {
    %c0_i32 = arith.constant 0 : i32
    %0 = arith.cmpi eq, %arg0, %c0_i32 : i32
    %1 = arith.extui %0 : i1 to i32
    %c0_i32_0 = arith.constant 0 : i32
    %2 = arith.cmpi ne, %1, %c0_i32_0 : i32
    scf.if %2 {
      %cst = arith.constant 0.000000e+00 : f32
      %21 = vector.broadcast %cst : f32 to vector<8x128xf32>
      %c0 = arith.constant 0 : index
      %c0_8 = arith.constant 0 : index
      %22 = vector.load %arg6[%c0, %c0_8] : memref<8x128xf32, #tpu.memory_space<vmem>>, vector<8x128xf32>
      tpu.vector_store %arg6[%c0, %c0_8], %21 {strides = array<i32>} : memref<8x128xf32, #tpu.memory_space<vmem>>, vector<8x128xf32>,
      %cst_9 = arith.constant 0.000000e+00 : f32
      %23 = vector.broadcast %cst_9 : f32 to vector<8x128xf32>
      %c0_10 = arith.constant 0 : index
      %c0_11 = arith.constant 0 : index
      %24 = vector.load %arg7[%c0_10, %c0_11] : memref<8x128xf32, #tpu.memory_space<vmem>>, vector<8x128xf32>
      tpu.vector_store %arg7[%c0_10, %c0_11], %23 {strides = array<i32>} : memref<8x128xf32, #tpu.memory_space<vmem>>, vector<8x128xf32>,
    } else {
    }
    %c1_i32 = arith.constant 1 : i32
    %3 = arith.cmpi slt, %arg0, %c1_i32 : i32
    %4 = arith.extui %3 : i1 to i32
    %c0_i32_1 = arith.constant 0 : i32
    %5 = arith.cmpi ne, %4, %c0_i32_1 : i32
    scf.if %5 {
      %cst = arith.constant 0.000000e+00 : f32
      %21 = vector.broadcast %cst : f32 to vector<1x128xf32>
      %c0 = arith.constant 0 : index
      %c0_8 = arith.constant 0 : index
      %22 = vector.load %arg1[%c0, %c0_8] : memref<12x128xf32, #tpu.memory_space<vmem>>, vector<12x128xf32>
      %c0_9 = arith.constant 0 : index
      %c0_10 = arith.constant 0 : index
      %23 = vector.load %arg2[%c0_9, %c0_10] : memref<12x128xf32, #tpu.memory_space<vmem>>, vector<12x128xf32>
      %24 = arith.subf %22, %23 : vector<12x128xf32>
      %25 = arith.mulf %24, %24 : vector<12x128xf32>
      %cst_11 = arith.constant dense<0.000000e+00> : vector<128xf32>
      %26 = vector.multi_reduction <add>, %25, %cst_11 [0] : vector<12x128xf32> to vector<128xf32>
      %27 = vector.shape_cast %26 : vector<128xf32> to vector<1x128xf32>
      %28 = arith.addf %21, %27 : vector<1x128xf32>
      %c0_12 = arith.constant 0 : index
      %c0_13 = arith.constant 0 : index
      %29 = vector.load %arg6[%c0_12, %c0_13] : memref<8x128xf32, #tpu.memory_space<vmem>>, vector<1x128xf32>
      %30 = arith.addf %29, %28 : vector<1x128xf32>
      %c0_14 = arith.constant 0 : index
      %c0_15 = arith.constant 0 : index
      %31 = vector.load %arg6[%c0_14, %c0_15] : memref<8x128xf32, #tpu.memory_space<vmem>>, vector<1x128xf32>
      tpu.vector_store %arg6[%c0_14, %c0_15], %30 {strides = array<i32>} : memref<8x128xf32, #tpu.memory_space<vmem>>, vector<1x128xf32>,
    } else {
    }
    %c1_i32_2 = arith.constant 1 : i32
    %6 = arith.cmpi sge, %arg0, %c1_i32_2 : i32
    %c2_i32 = arith.constant 2 : i32
    %7 = arith.cmpi slt, %arg0, %c2_i32 : i32
    %8 = arith.andi %6, %7 : i1
    %9 = arith.extui %8 : i1 to i32
    %c0_i32_3 = arith.constant 0 : i32
    %10 = arith.cmpi ne, %9, %c0_i32_3 : i32
    scf.if %10 {
      %cst = arith.constant 0.000000e+00 : f32
      %21 = vector.broadcast %cst : f32 to vector<1x128xf32>
      %c0 = arith.constant 0 : index
      %c0_8 = arith.constant 0 : index
      %22 = vector.load %arg3[%c0, %c0_8] : memref<8x128xf32, #tpu.memory_space<vmem>>, vector<8x128xf32>
      %23 = math.log %22 : vector<8x128xf32>
      %cst_9 = arith.constant dense<0.000000e+00> : vector<128xf32>
      %24 = vector.multi_reduction <add>, %23, %cst_9 [0] : vector<8x128xf32> to vector<128xf32>
      %25 = vector.shape_cast %24 : vector<128xf32> to vector<1x128xf32>
      %26 = arith.addf %21, %25 : vector<1x128xf32>
      %c0_10 = arith.constant 0 : index
      %c0_11 = arith.constant 0 : index
      %27 = vector.load %arg7[%c0_10, %c0_11] : memref<8x128xf32, #tpu.memory_space<vmem>>, vector<1x128xf32>
      %28 = arith.addf %27, %26 : vector<1x128xf32>
      %c0_12 = arith.constant 0 : index
      %c0_13 = arith.constant 0 : index
      %29 = vector.load %arg7[%c0_12, %c0_13] : memref<8x128xf32, #tpu.memory_space<vmem>>, vector<1x128xf32>
      tpu.vector_store %arg7[%c0_12, %c0_13], %28 {strides = array<i32>} : memref<8x128xf32, #tpu.memory_space<vmem>>, vector<1x128xf32>,
    } else {
    }
    %c2_i32_4 = arith.constant 2 : i32
    %11 = arith.cmpi sge, %arg0, %c2_i32_4 : i32
    %c3_i32 = arith.constant 3 : i32
    %12 = arith.cmpi slt, %arg0, %c3_i32 : i32
    %13 = arith.andi %11, %12 : i1
    %14 = arith.extui %13 : i1 to i32
    %c0_i32_5 = arith.constant 0 : i32
    %15 = arith.cmpi ne, %14, %c0_i32_5 : i32
    scf.if %15 {
      %cst = arith.constant 0.000000e+00 : f32
      %21 = vector.broadcast %cst : f32 to vector<1x128xf32>
      %c0 = arith.constant 0 : index
      %c0_8 = arith.constant 0 : index
      %22 = vector.load %arg4[%c0, %c0_8] : memref<1x128xf32, #tpu.memory_space<vmem>>, vector<1x128xf32>
      %23 = math.log %22 : vector<1x128xf32>
      %cst_9 = arith.constant dense<0.000000e+00> : vector<128xf32>
      %24 = vector.multi_reduction <add>, %23, %cst_9 [0] : vector<1x128xf32> to vector<128xf32>
      %25 = vector.shape_cast %24 : vector<128xf32> to vector<1x128xf32>
      %26 = arith.addf %21, %25 : vector<1x128xf32>
      %c0_10 = arith.constant 0 : index
      %c0_11 = arith.constant 0 : index
      %27 = vector.load %arg7[%c0_10, %c0_11] : memref<8x128xf32, #tpu.memory_space<vmem>>, vector<1x128xf32>
      %28 = arith.addf %27, %26 : vector<1x128xf32>
      %c0_12 = arith.constant 0 : index
      %c0_13 = arith.constant 0 : index
      %29 = vector.load %arg7[%c0_12, %c0_13] : memref<8x128xf32, #tpu.memory_space<vmem>>, vector<1x128xf32>
      tpu.vector_store %arg7[%c0_12, %c0_13], %28 {strides = array<i32>} : memref<8x128xf32, #tpu.memory_space<vmem>>, vector<1x128xf32>,
    } else {
    }
    %c3_i32_6 = arith.constant 3 : i32
    %16 = arith.cmpi sge, %arg0, %c3_i32_6 : i32
    %c4_i32 = arith.constant 4 : i32
    %17 = arith.cmpi slt, %arg0, %c4_i32 : i32
    %18 = arith.andi %16, %17 : i1
    %19 = arith.extui %18 : i1 to i32
    %c0_i32_7 = arith.constant 0 : i32
    %20 = arith.cmpi ne, %19, %c0_i32_7 : i32
    scf.if %20 {
      %cst = arith.constant 0.000000e+00 : f32
      %21 = vector.broadcast %cst : f32 to vector<1x128xf32>
      %c0 = arith.constant 0 : index
      %c0_8 = arith.constant 0 : index
      %22 = vector.load %arg5[%c0, %c0_8] : memref<2x128xf32, #tpu.memory_space<vmem>>, vector<2x128xf32>
      %23 = math.log %22 : vector<2x128xf32>
      %cst_9 = arith.constant dense<0.000000e+00> : vector<128xf32>
      %24 = vector.multi_reduction <add>, %23, %cst_9 [0] : vector<2x128xf32> to vector<128xf32>
      %25 = vector.shape_cast %24 : vector<128xf32> to vector<1x128xf32>
      %26 = arith.addf %21, %25 : vector<1x128xf32>
      %c0_10 = arith.constant 0 : index
      %c0_11 = arith.constant 0 : index
      %27 = vector.load %arg7[%c0_10, %c0_11] : memref<8x128xf32, #tpu.memory_space<vmem>>, vector<1x128xf32>
      %28 = arith.addf %27, %26 : vector<1x128xf32>
      %c0_12 = arith.constant 0 : index
      %c0_13 = arith.constant 0 : index
      %29 = vector.load %arg7[%c0_12, %c0_13] : memref<8x128xf32, #tpu.memory_space<vmem>>, vector<1x128xf32>
      tpu.vector_store %arg7[%c0_12, %c0_13], %28 {strides = array<i32>} : memref<8x128xf32, #tpu.memory_space<vmem>>, vector<1x128xf32>,
    } else {
    }
    return
  }
  func.func @transform_0(%arg0: i32) -> (i32, i32) {
    %c0_i32 = arith.constant 0 : i32
    %0 = arith.minsi %arg0, %c0_i32 : i32
    %c0_i32_0 = arith.constant 0 : i32
    %c0_i32_1 = arith.constant 0 : i32
    return %0, %c0_i32_0 : i32, i32
  }
  func.func @transform_1(%arg0: i32) -> (i32, i32) {
    %c0_i32 = arith.constant 0 : i32
    %0 = arith.minsi %arg0, %c0_i32 : i32
    %c0_i32_0 = arith.constant 0 : i32
    %c0_i32_1 = arith.constant 0 : i32
    return %0, %c0_i32_0 : i32, i32
  }
  func.func @transform_2(%arg0: i32) -> (i32, i32) {
    %c1_i32 = arith.constant 1 : i32
    %0 = arith.subi %arg0, %c1_i32 : i32
    %c0_i32 = arith.constant 0 : i32
    %c0_i32_0 = arith.constant 0 : i32
    %1 = arith.maxsi %c0_i32, %0 : i32
    %2 = arith.minsi %c0_i32_0, %1 : i32
    %c0_i32_1 = arith.constant 0 : i32
    %c0_i32_2 = arith.constant 0 : i32
    return %2, %c0_i32_1 : i32, i32
  }
  func.func @transform_3(%arg0: i32) -> (i32, i32) {
    %c2_i32 = arith.constant 2 : i32
    %0 = arith.subi %arg0, %c2_i32 : i32
    %c0_i32 = arith.constant 0 : i32
    %c0_i32_0 = arith.constant 0 : i32
    %1 = arith.maxsi %c0_i32, %0 : i32
    %2 = arith.minsi %c0_i32_0, %1 : i32
    %c0_i32_1 = arith.constant 0 : i32
    %c0_i32_2 = arith.constant 0 : i32
    return %2, %c0_i32_1 : i32, i32
  }
  func.func @transform_4(%arg0: i32) -> (i32, i32) {
    %c3_i32 = arith.constant 3 : i32
    %0 = arith.subi %arg0, %c3_i32 : i32
    %c0_i32 = arith.constant 0 : i32
    %c0_i32_0 = arith.constant 0 : i32
    %1 = arith.maxsi %c0_i32, %0 : i32
    %2 = arith.minsi %c0_i32_0, %1 : i32
    %c0_i32_1 = arith.constant 0 : i32
    %c0_i32_2 = arith.constant 0 : i32
    return %2, %c0_i32_1 : i32, i32
  }
  func.func @transform_5(%arg0: i32) -> (i32, i32) {
    %c0_i32 = arith.constant 0 : i32
    %c0_i32_0 = arith.constant 0 : i32
    %c0_i32_1 = arith.constant 0 : i32
    return %c0_i32, %c0_i32_0 : i32, i32
  }
  func.func @transform_6(%arg0: i32) -> (i32, i32) {
    %c0_i32 = arith.constant 0 : i32
    %c0_i32_0 = arith.constant 0 : i32
    %c0_i32_1 = arith.constant 0 : i32
    return %c0_i32, %c0_i32_0 : i32, i32
  }
}

</mosaic_0001>

<bundles_post_ra>
// kernel: tpu_custom_call.1
= control target key start
LH: loop header
LB: loop body
LE: loop exit
PB: predicated region body
PF: predicated region fallthrough
CT: control target
= control target key end

     0   :  { %12 = vsyncpa [#allocation3], 0  ;;  %s1366_s0 = inlined_call_operand.hbm [shape: f32[12,128], index: 0, kind: input, shape index: {}]   ;;  %s1367_s1 = inlined_call_operand.hbm [shape: f32[12,128], index: 1, kind: input, shape index: {}]   ;;  %s1368_s2 = inlined_call_operand.hbm [shape: f32[8,128], index: 2, kind: input, shape index: {}]   ;;  %s1369_s3 = inlined_call_operand.vmem [shape: f32[1,128], index: 3, kind: input, shape index: {}]   ;;  %s1370_s4 = inlined_call_operand.vmem [shape: f32[2,128], index: 4, kind: input, shape index: {}]   ;;  %s1371_s5 = inlined_call_operand.hbm [shape: f32[8,128], index: 5, kind: output, shape index: {0}]   ;;  %s1372_s6 = inlined_call_operand.hbm [shape: f32[8,128], index: 6, kind: output, shape index: {1}]  }
   0x1   :  { %14 = vsyncpa [#allocation3 + $0x1], 0 }
   0x2   :  { %15 = vsyncpa [#allocation6], 0 }
   0x3   :  { %17 = vsyncpa [#allocation6 + $0x1], 0 }
   0x4   :  { %18 = vsyncpa [#allocation4], 0 }
   0x5   :  { %19 = vsyncpa [#allocation10], 0  ;;  %s1086_s21 = smov 0   ;;  %s1088_s22 = smov 0  }
   0x6   :  { %s1090_s23 = smov 0   ;;  %s1092_s24 = smov 0  }
   0x7 LB: > { %s1105_s25 = sadd.s32 4294967295, %s1041_s24   ;;  %s1108_s26 = sadd.s32 1, %s1041_s24   ;;  %s1041_s24 = sphi %s1092_s24, %s1392_s24   ;;  %s1037_s23 = sphi %s1090_s23, %s1391_s23   ;;  %s1033_s22 = sphi %s1088_s22, %s1390_s22   ;;  %s1029_s21 = sphi %s1086_s21, %s1389_s21  }
   0x8   : > { %p29_p0 = scmp.lt.s32.totalorder %s1041_s24, 0  ;;  %p31_p1 = scmp.lt.s32.totalorder %s1108_s26, 0 }
   0x9   : > { %s36_s27 = sadd.s32 1, %s1037_s23  ;;  %p43_p2 = scmp.ne.s32.totalorder %s1037_s23, %s1033_s22 }
   0xa   : > { %s1116_s28 = scalar_select %p29_p0, %s1041_s24, 0 }
   0xb   : > { %s32_s29 = scalar_select %p31_p1, %s1108_s26, 0 }
   0xc   : > { %p1375_p3 = scmp.eq.s32.totalorder %s1041_s24, 0  ;;  %p49_p4 = scmp.ne.s32.totalorder %s1033_s22, %s1029_s21 }
   0xd   : > { %s33_s30 = ssub.s32 %s1116_s28, %s32_s29  ;;  %p1373_p5 = scmp.eq.s32.totalorder %s1105_s25, 0 }
   0xe   : > { %p34_p6 = scmp.eq.s32.totalorder %s33_s30, 0  ;;  %p45_p7 = por %p1375_p3, %p43_p2 }
   0xf   : > { %p1127_p8 = por %p1373_p5, %p49_p4  ;;  %p1374_p9 = scmp.lt.s32.totalorder %s1041_s24, 4 }
  0x10   : > { %s1132_s8 = scalar_select %p34_p6, %s1037_s23, %s36_s27  }
  0x11   : > { %s1377_s7 = scalar_select %p1127_p8, 1, 0 }
  0x12   : > { %s253_s9 = sand.u32 1, %s1037_s23   ;;  %s776_s11 = sshll.u32 %s1116_s28, 8 }
  0x13   : > { %s1138_s10 = sshll.u32 %s253_s9, 4  ;;  %p1143_p10 = pnand %p1374_p9, %p45_p7 }
  0x14   : > { %s276_s13 = sand.u32 1, %s1041_s24   ;;  %s1153_s16 = scalar_lea.hbm %s1367_s1, %s776_s11 }
  0x15   : > { %s280_s17 = scalar_lea.vmem [#allocation5], %s1138_s10  ;;  %s1160_s19 = scalar_lea.sflag [#allocation6], %s276_s13 }
  0x16   : > { %s289_s18 = sshll.u32 %s280_s17, 4  ;;  %s851_s20 = scalar_lea.hbm %s1153_s16, 256  ;;  %s1157_s18 = int_to_ptr.vmem [resolvable:$true] %s289_s18 }
  0x17   : > { %p852_p13 = scmp.ne.s32.totalorder %s1153_s16, %s851_s20  ;;  %p853_p0 = pneg %p1143_p10 }
  0x18   : > { %s856_s29 = scalar_lea.hbm %s1367_s1, 256  ;;  %p857_p4 = scmp.lt.u32.totalorder %s1153_s16, %s1367_s1 }
  0x19   : > { %p854_p1 = pnand %p853_p0, %p852_p13  ;;  %p858_p6 = scmp.lt.u32.totalorder %s856_s29, %s851_s20 }
  0x1a   : > { %p860_p5 = scmp.lt.u32.totalorder %s851_s20, %s1153_s16 }
  0x1b   : > { %p855_p2 = pneg %p854_p1  ;;  %p859_p7 = por %p858_p6, %p857_p4 }
  0x1d   : > { %p861_p9 = por %p860_p5, %p859_p7 }
  0x1f   : > { %p862_p3 = pnand %p861_p9, %p855_p2 }
  0x21   : > { %865 = shalt.err (!%p862_p3)
}
  0x22   : > { %s866_s13 = scalar_lea.vmem %s1157_s18, 256  ;;  %s1043_s15 = smov [#allocation5]  }
  0x23   : > { %p867_p13 = scmp.ne.s32.totalorder %s1157_s18, %s866_s13  ;;  %s871_s17 = sshll.u32 %s1043_s15, 4  ;;  %s872_s17 = int_to_ptr.vmem [resolvable:$false] %s871_s17 }
  0x24   : > { %s873_s21 = scalar_lea.vmem %s872_s17, 512  ;;  %p874_p12 = scmp.lt.s32.totalorder %s1157_s18, %s872_s17 }
  0x25   : > { %p869_p1 = pnand %p867_p13, %p853_p0  ;;  %p875_p4 = scmp.lt.s32.totalorder %s873_s21, %s866_s13 }
  0x27   : > { %p870_p11 = pneg %p869_p1  ;;  %p876_p6 = por %p875_p4, %p874_p12 }
  0x29   : > { %p877_p5 = pnand %p876_p6, %p870_p11 }
  0x2b   : > { %880 = shalt.err (!%p877_p5)
}
  0x2c   : > { %s1044_s20 = smov 128   ;;  %s1045_s27 = smov 8  }
  0x2d   : > { %798 = dma.hbm_to_vmem [thread:$0]  (!%p1143_p10), %s1153_s16, 256, %s1157_s18, %s1160_s19, %s1044_s20, %s1044_s20, %s1045_s27  }
  0x2e   : > { %p1379_p3 = scmp.lt.s32.totalorder %s1041_s24, 5  ;;  %p1380_p9 = scmp.ge.s32.totalorder %s1041_s24, 1 }
  0x2f   : > { %s1204_s13 = scalar_lea.hbm %s1366_s0, %s776_s11  ;;  %s257_s15 = scalar_lea.vmem [#allocation2], %s1138_s10 }
  0x30   : > { %p1195_p11 = pnand %p1380_p9, %p1379_p3  ;;  %s266_s17 = sshll.u32 %s257_s15, 4  ;;  %s1207_s17 = int_to_ptr.vmem [resolvable:$true] %s266_s17 }
  0x31   : > { %s1046_s16 = smov [#allocation7]   ;;  %s1213_s21 = scalar_lea.sflag [#allocation3], %s253_s9 }
  0x32   : > { %s1381_s29 = scalar_select %p1195_p11, 1, 0 }
  0x33   : > { %s1209_s18 = sshll.u32 %s1046_s16, 4  ;;  %s881_s28 = scalar_lea.hbm %s1204_s13, 256  ;;  %s316_s18 = int_to_ptr.vmem [resolvable:$true] %s1209_s18 }
  0x34   : > { %p882_p12 = scmp.ne.s32.totalorder %s1204_s13, %s881_s28  ;;  %s886_s14 = scalar_lea.hbm %s1366_s0, 256 }
  0x35   : > { %p887_p13 = scmp.lt.u32.totalorder %s1204_s13, %s1366_s0  ;;  %p888_p1 = scmp.lt.u32.totalorder %s886_s14, %s881_s28 }
  0x36   : > { %p884_p2 = pnand %p882_p12, %p853_p0  ;;  %p890_p6 = scmp.lt.u32.totalorder %s881_s28, %s1204_s13 }
  0x37   : > { %p889_p4 = por %p888_p1, %p887_p13 }
  0x38   : > { %p885_p7 = pneg %p884_p2 }
  0x39   : > { %p891_p5 = por %p890_p6, %p889_p4 }
  0x3b   : > { %p892_p3 = pnand %p891_p5, %p885_p7 }
  0x3d   : > { %895 = shalt.err (!%p892_p3)
}
  0x3e   : > { %s896_s9 = scalar_lea.vmem %s1207_s17, 256  ;;  %s1047_s16 = smov [#allocation2]  }
  0x3f   : > { %p897_p9 = scmp.ne.s32.totalorder %s1207_s17, %s896_s9  ;;  %s901_s11 = sshll.u32 %s1047_s16, 4  ;;  %s902_s11 = int_to_ptr.vmem [resolvable:$false] %s901_s11 }
  0x40   : > { %s903_s30 = scalar_lea.vmem %s902_s11, 512  ;;  %p904_p8 = scmp.lt.s32.totalorder %s1207_s17, %s902_s11 }
  0x41   : > { %p899_p12 = pnand %p897_p9, %p853_p0  ;;  %p905_p13 = scmp.lt.s32.totalorder %s903_s30, %s896_s9 }
  0x43   : > { %p900_p2 = pneg %p899_p12  ;;  %p906_p1 = por %p905_p13, %p904_p8 }
  0x45   : > { %p907_p4 = pnand %p906_p1, %p900_p2 }
  0x47   : > { %910 = shalt.err (!%p907_p4)
}
  0x48   : > { %795 = dma.hbm_to_vmem [thread:$0]  (!%p1143_p10), %s1204_s13, 256, %s1207_s17, %s1213_s21, %s1044_s20, %s1044_s20, %s1045_s27  }
  0x49   : > { %p1382_p0 = scmp.eq.s32.totalorder %s1041_s24, 0  ;;  %p1383_p7 = scmp.lt.s32.totalorder %s1041_s24, 4 }
  0x4a   : > { %s911_s12 = scalar_lea.hbm %s1368_s2, 128 }
  0x4b   : > { %p1247_p6 = pnand %p1383_p7, %p1382_p0  ;;  %p912_p8 = scmp.ne.s32.totalorder %s1368_s2, %s911_s12 }
  0x4c   : > { %p918_p9 = scmp.lt.u32.totalorder %s911_s12, %s1368_s2 }
  0x4d   : > { %p913_p5 = pneg %p1247_p6 }
  0x4f   : > { %p914_p3 = pnand %p913_p5, %p912_p8 }
  0x51   : > { %p915_p10 = pneg %p914_p3 }
  0x53   : > { %p920_p12 = pnand %p918_p9, %p915_p10 }
  0x55   : > { %923 = shalt.err (!%p920_p12)
}
  0x56   : > { %s924_s24 = scalar_lea.vmem %s316_s18, 128  ;;  %s931_s13 = scalar_lea.vmem %s316_s18, 256 }
  0x57   : > { %p925_p2 = scmp.ne.s32.totalorder %s316_s18, %s924_s24  ;;  %p932_p4 = scmp.lt.s32.totalorder %s316_s18, %s316_s18 }
  0x58   : > { %p933_p0 = scmp.lt.s32.totalorder %s931_s13, %s924_s24 }
  0x59   : > { %p927_p13 = pnand %p925_p2, %p913_p5 }
  0x5a   : > { %p934_p7 = por %p933_p0, %p932_p4 }
  0x5b   : > { %p928_p1 = pneg %p927_p13 }
  0x5d   : > { %p935_p11 = pnand %p934_p7, %p928_p1 }
  0x5f   : > { %938 = shalt.err (!%p935_p11)
}
  0x60   : > { %801 = dma.hbm_to_vmem [thread:$0]  (!%p1247_p6), %s1368_s2, 128, %s316_s18, %s1160_s19  }
  0x61   : > { %p1385_p8 = scmp.ne.s32.totalorder %s1381_s29, 0 }
  0x62   : > { %s359_s16 = sand.u32 (!%p1385_p8), 1, %s1033_s22   ;;  %p1386_p5 = scmp.ne.s32.totalorder (!%p1385_p8), %s1377_s7, 0 }
  0x63   : > { %357 = sbr.rel (%p1385_p8) target bundleno = 280 (0x118), region = 40  ;;  %s752_s11 = sshll.u32 (!%p1385_p8), %s359_s16, 4 }
  0x64   : > { %s360_s30 = scalar_lea.sflag (!%p1385_p8), [#allocation3], %s359_s16  ;;  %s363_s14 = scalar_lea.vmem (!%p1385_p8), [#allocation2], %s752_s11 }
  0x6a   : > { %1008 = dma.done.wait (%p1386_p5), %s360_s30, 256  }
  0x6b   : > { %1010 = vsyncadd (%p1386_p5), %s360_s30, 4294967040  ;;  %s368_s28 = sand.u32 1, %s1105_s25   ;;  %s372_s12 = scalar_lea.vmem [#allocation5], %s752_s11 }
  0x6c   : > { %s369_s10 = scalar_lea.sflag [#allocation6], %s368_s28 }
  0x6d   : > { %1012 = dma.done.wait (%p1386_p5), %s369_s10, 256  }
  0x6e   : > { %1014 = vsyncadd (%p1386_p5), %s369_s10, 4294967040  ;;  %p1387_p11 = scmp.eq.s32.totalorder %s1105_s25, 0 }
  0x70   : > { %1016 = dma.done.wait (%p1387_p11), %s369_s10, 128   ;;  %p1388_p6 = pmov %p1387_p11 }
  0x71   : > { %p768_p3 = scmp.ne.s32.totalorder %s1105_s25, 0 }
  0x72   : > { %1018 = vsyncadd (%p1388_p6), %s369_s10, 4294967168  ;;  %v1048_v0 = vmov (!%p768_p3), 0.0  }
  0x73   : > { %473 = sbr.rel (%p768_p3) target bundleno = 122 (0x7a), region = 56  ;;  %474 = vst [vmem:[#allocation8] sm:$0xff] (!%p768_p3), %v1048_v0  ;;  %475 = vst [vmem:[#allocation9] sm:$0xff] (!%p768_p3), %v1048_v0 }
  0x7a PF: > { %p769_p10 = scmp.ge.s32.totalorder %s1105_s25, 1 }
  0x7b   : > { %v480_v1 = vld [vmem:[%s363_s14] sm:$0xff] (!%p769_p10)  ;;  %v481_v2 = vld [vmem:[%s363_s14 + $0x8] sm:$0xf] (!%p769_p10)  ;;  %vm488_vm0 = vcmask (!%p769_p10), 1043456  }
  0x7c   : > { %479 = sbr.rel (%p769_p10) target bundleno = 147 (0x93), region = 60  ;;  %v482_v3 = vld [vmem:[%s372_s12] sm:$0xff] (!%p769_p10)  ;;  %v483_v4 = vld [vmem:[%s372_s12 + $0x8] sm:$0xf] (!%p769_p10) }
  0x7d   : > { %v484_v5 = vsub.f32 (!%p769_p10), %v480_v1, %v482_v3  ;;  %v485_v6 = vsub.f32 (!%p769_p10), %v481_v2, %v483_v4  ;;  %v498_v16 = vld [vmem:[#allocation8] sm:$0x1] (!%p769_p10) }
  0x7f   : > { %v486_v7 = vmul.f32 (!%p769_p10), %v484_v5, %v484_v5  ;;  %v487_v8 = vmul.f32 (!%p769_p10), %v485_v6, %v485_v6 }
  0x81   : > { %v489_v9 = vsel (!%p769_p10), %vm488_vm0, %v487_v8, 0.0 }
  0x82   : > { %v490_v10 = vadd.f32 (!%p769_p10), %v489_v9, %v486_v7 }
  0x84   : > { %v491_v11 = vrot.slane %v490_v10, 4 }
  0x86   : > { %v492_v12 = vadd.f32 %v491_v11, %v490_v10 }
  0x88   : > { %v493_v13 = vrot.slane %v492_v12, 2 }
  0x8a   : > { %v494_v14 = vadd.f32 %v493_v13, %v492_v12 }
  0x8c   : > { %v495_v15 = vrot.slane %v494_v14, 1 }
  0x8e   : > { %v496_v17 = vadd.f32 %v495_v15, %v494_v14 }
  0x90   : > { %v499_v18 = vadd.f32 %v498_v16, %v496_v17 }
  0x92   : > { %500 = vst [vmem:[#allocation8] sm:$0x1] %v499_v18 }
  0x93 PF: > { %p502_p9 = scmp.lt.s32.totalorder %s1105_s25, 2 }
  0x95   : > { %p503_p12 = pnand %p769_p10, %p502_p9 }
  0x96   : > { %v507_v19 = vld [vmem:[#allocation7] sm:$0xff] (!%p503_p12)  ;;  %v517_v27 = vld [vmem:[#allocation9] sm:$0x1] (!%p503_p12) }
  0x97   : > { %506 = sbr.rel (%p503_p12) target bundleno = 179 (0xb3), region = 64  ;;  %845 = vlog2.f32 (!%p503_p12), %v507_v19 }
  0xa1   : > { %v846_v20 = vpop.eup %845 }
  0xa2   : > { %v509_v21 = vmul.f32 0.6931472, %v846_v20 }
  0xa4   : > { %v510_v22 = vrot.slane %v509_v21, 4 }
  0xa6   : > { %v511_v23 = vadd.f32 %v510_v22, %v509_v21 }
  0xa8   : > { %v512_v24 = vrot.slane %v511_v23, 2 }
  0xaa   : > { %v513_v25 = vadd.f32 %v512_v24, %v511_v23 }
  0xac   : > { %v514_v26 = vrot.slane %v513_v25, 1 }
  0xae   : > { %v515_v28 = vadd.f32 %v514_v26, %v513_v25 }
  0xb0   : > { %v518_v29 = vadd.f32 %v517_v27, %v515_v28 }
  0xb2   : > { %519 = vst [vmem:[#allocation9] sm:$0x1] %v518_v29 }
  0xb3 PF: > { %p520_p2 = scmp.ge.s32.totalorder %s1105_s25, 2  ;;  %p521_p13 = scmp.lt.s32.totalorder %s1105_s25, 3 }
  0xb5   : > { %p522_p1 = pnand %p521_p13, %p520_p2 }
  0xb6   : > { %v526_v30 = vld [vmem:[%s1369_s3] sm:$0x1] (!%p522_p1) }
  0xb7   : > { %525 = sbr.rel (%p522_p1) target bundleno = 199 (0xc7), region = 68  ;;  %847 = vlog2.f32 (!%p522_p1), %v526_v30 }
  0xb9   : > { %v531_v32 = vld [vmem:[#allocation9] sm:$0x1] (!%p522_p1) }
  0xc1   : > { %v848_v31 = vpop.eup %847 }
  0xc2   : > { %v528_v33 = vmul.f32 0.6931472, %v848_v31 }
  0xc4   : > { %v532_v34 = vadd.f32 %v531_v32, %v528_v33 }
  0xc6   : > { %533 = vst [vmem:[#allocation9] sm:$0x1] %v532_v34 }
  0xc7 PF: > { %p534_p4 = scmp.ge.s32.totalorder %s1105_s25, 3  ;;  %p535_p0 = scmp.lt.s32.totalorder %s1105_s25, 4 }
  0xc9   : > { %p536_p7 = pnand %p535_p0, %p534_p4 }
  0xca   : > { %v540_v35 = vld [vmem:[%s1370_s4] sm:$0x3] (!%p536_p7)  ;;  %vm543_vm1 = vcmask (!%p536_p7), 1041408  }
  0xcb   : > { %539 = sbr.rel (%p536_p7) target bundleno = 232 (0xe8), region = 72  ;;  %849 = vlog2.f32 (!%p536_p7), %v540_v35 }
  0xcd   : > { %v552_v44 = vld [vmem:[#allocation9] sm:$0x1] (!%p536_p7) }
  0xd5   : > { %v850_v36 = vpop.eup %849 }
  0xd6   : > { %v542_v37 = vmul.f32 0.6931472, %v850_v36 }
  0xd8   : > { %v544_v38 = vsel %vm543_vm1, %v542_v37, 0.0 }
  0xd9   : > { %v545_v39 = vrot.slane %v544_v38, 4 }
  0xdb   : > { %v546_v40 = vadd.f32 %v545_v39, %v544_v38 }
  0xdd   : > { %v547_v41 = vrot.slane %v546_v40, 2 }
  0xdf   : > { %v548_v42 = vadd.f32 %v547_v41, %v546_v40 }
  0xe1   : > { %v549_v43 = vrot.slane %v548_v42, 1 }
  0xe3   : > { %v550_v45 = vadd.f32 %v549_v43, %v548_v42 }
  0xe5   : > { %v553_v46 = vadd.f32 %v552_v44, %v550_v45 }
  0xe7   : > { %554 = vst [vmem:[#allocation9] sm:$0x1] %v553_v46 }
  0xe8 PF: > { %p803_p8 = scmp.eq.s32.totalorder %s1105_s25, 3  ;;  %s1049_s15 = smov [#allocation8]  }
  0xe9   : > { %s562_s9 = sshll.u32 %s1049_s15, 4  ;;  %s1050_s20 = smov [#allocation9]   ;;  %s563_s9 = int_to_ptr.vmem [resolvable:$true] %s562_s9 }
  0xea   : > { %s573_s27 = sshll.u32 %s1050_s20, 4  ;;  %s939_s24 = scalar_lea.vmem %s563_s9, 128  ;;  %s1302_s27 = int_to_ptr.vmem [resolvable:$true] %s573_s27 }
  0xeb   : > { %p940_p5 = scmp.ne.s32.totalorder %s563_s9, %s939_s24  ;;  %p946_p3 = scmp.lt.s32.totalorder %s563_s9, %s563_s9 }
  0xec   : > { %p947_p10 = scmp.lt.s32.totalorder %s939_s24, %s939_s24 }
  0xed   : > { %p941_p11 = pnand %p940_p5, %p803_p8 }
  0xee   : > { %p948_p9 = por %p947_p10, %p946_p3 }
  0xef   : > { %p942_p6 = pneg %p941_p11 }
  0xf1   : > { %p949_p12 = pnand %p948_p9, %p942_p6 }
  0xf3   : > { %952 = shalt.err (!%p949_p12)
}
  0xf4   : > { %s953_s21 = scalar_lea.hbm %s1371_s5, 128 }
  0xf5   : > { %p954_p2 = scmp.ne.s32.totalorder %s1371_s5, %s953_s21  ;;  %p959_p4 = scmp.lt.u32.totalorder %s953_s21, %s1371_s5 }
  0xf7   : > { %p955_p13 = pnand %p954_p2, %p803_p8 }
  0xf9   : > { %p956_p1 = pneg %p955_p13 }
  0xfb   : > { %p961_p0 = pnand %p959_p4, %p956_p1 }
  0xfd   : > { %964 = shalt.err (!%p961_p0)
}
  0xfe   : > { %785 = dma.vmem_to_hbm [thread:$0]  (%p803_p8), %s563_s9, 128, %s1371_s5, [#allocation4]  }
  0xff   : > { %s965_s12 = scalar_lea.vmem %s1302_s27, 128  ;;  %p972_p6 = scmp.lt.s32.totalorder %s1302_s27, %s1302_s27 }
 0x100   : > { %p966_p7 = scmp.ne.s32.totalorder %s1302_s27, %s965_s12  ;;  %p973_p3 = scmp.lt.s32.totalorder %s965_s12, %s965_s12 }
 0x102   : > { %p967_p5 = pnand %p966_p7, %p803_p8  ;;  %p974_p10 = por %p973_p3, %p972_p6 }
 0x104   : > { %p968_p11 = pneg %p967_p5 }
 0x106   : > { %p975_p9 = pnand %p974_p10, %p968_p11 }
 0x108   : > { %978 = shalt.err (!%p975_p9)
}
 0x109   : > { %s979_s29 = scalar_lea.hbm %s1372_s6, 128 }
 0x10a   : > { %p980_p12 = scmp.ne.s32.totalorder %s1372_s6, %s979_s29  ;;  %p985_p1 = scmp.lt.u32.totalorder %s979_s29, %s1372_s6 }
 0x10c   : > { %p981_p2 = pnand %p980_p12, %p803_p8 }
 0x10e   : > { %p982_p13 = pneg %p981_p2 }
 0x110   : > { %p987_p4 = pnand %p985_p1, %p982_p13 }
 0x112   : > { %990 = shalt.err (!%p987_p4)
}
 0x113   : > { %787 = dma.vmem_to_hbm [thread:$0]  (%p803_p8), %s1302_s27, 128, %s1372_s6, [#allocation10]  }
 0x114   : > { %1020 = dma.done.wait (%p803_p8), [#allocation4], 128  }
 0x115   : > { %1022 = vsyncadd (%p803_p8), [#allocation4], 4294967168 }
 0x116   : > { %1024 = dma.done.wait (%p803_p8), [#allocation10], 128  }
 0x117   : > { %1026 = vsyncadd (%p803_p8), [#allocation10], 4294967168 }
 0x118 PF: > { %p22_p0 = scmp.ge.s32.totalorder %s1108_s26, 6   ;;  %s1389_s21 = smov %s1033_s22 }
 0x119   : > { %s1390_s22 = smov %s1037_s23  ;;  %s1391_s23 = smov %s1132_s8 }
 0x11a   : > { %s1392_s24 = smov %s1108_s26  ;;  %24 = sbr.rel (!%p22_p0) target bundleno = 7 (0x7), region = 135 }
 0x121   :  { %590 = vsyncpa [#allocation3], 1 }
 0x122   :  { %592 = vsyncpa [#allocation3 + $0x1], 1 }
 0x123   :  { %593 = vsyncpa [#allocation6], 1 }
 0x124   :  { %595 = vsyncpa [#allocation6 + $0x1], 1 }
 0x125   :  { %596 = vsyncpa [#allocation4], 1 }
 0x126   :  { %598 = vsyncpa [#allocation4 + $0x1], 1 }
 0x127   :  { %599 = vsyncpa [#allocation10], 1 }

</bundles_post_ra>
